<compile_context>
chip_gen: v7x
topology: tpu7x:2x2x1
jax: 0.10.0
libtpu: 0.0.40
codegen_flags: <defaults>
</compile_context>

<pallas_src>
import functools

import jax
import jax.numpy as jnp
from jax.experimental import pallas as pl
from jax.experimental.pallas import tpu as pltpu


def _layernorm_kernel(x_ref, a_ref, b_ref, *rest, eps, feat, k):
    # x_ref: (tile_rows, feat_lane); a_ref / b_ref: (1, feat_lane), resident.
    # If k > 1 (lane-dense fold), rest = (seg_ref, o_ref) where seg_ref is a
    # (feat_lane, feat_lane) block-diagonal ones matrix mapping each lane to the
    # sum over its own segment of `feat` lanes. Otherwise rest = (o_ref,).
    if k > 1:
        seg_ref, o_ref = rest
    else:
        (o_ref,) = rest

    x = x_ref[...].astype(jnp.float32)
    a = a_ref[...].astype(jnp.float32)          # hoisted casts, once per step
    b = b_ref[...].astype(jnp.float32)

    inv_n = 1.0 / float(feat)
    # torch.std default is UNBIASED (N-1). feat == 1 would be NaN in torch; we
    # clamp the divisor (documented divergence).
    inv_nm1 = 1.0 / float(max(feat - 1, 1))

    if k > 1:
        seg = seg_ref[...]                                   # (L, L) f32, block-diag ones
        # Segmented (per-original-row) mean, broadcast back to every lane of
        # its segment in a single MXU matmul. MXU is idle in this kernel, so
        # this is free; all HBM traffic stays 128-lane dense.
        mean = jnp.dot(x, seg, preferred_element_type=jnp.float32) * inv_n
        c = x - mean
        # Two-pass (centered) variance: no cancellation issues.
        var = jnp.dot(c * c, seg, preferred_element_type=jnp.float32) * inv_nm1
    else:
        mean = jnp.sum(x, axis=-1, keepdims=True) * inv_n    # (tile_rows, 1)
        c = x - mean
        var = jnp.sum(c * c, axis=-1, keepdims=True) * inv_nm1

    var = jnp.maximum(var, 0.0)
    # Per-row reciprocal on EUP (separate slot) instead of a per-element divide.
    inv_std = pl.reciprocal(jnp.sqrt(var) + eps, approx=False)

    o_ref[...] = (c * inv_std * a + b).astype(o_ref.dtype)


def _vmem_limit_bytes():
    """3/4 of physical VMEM: ~96 MiB on v5e/v6e (128 MiB), ~48 MiB on v7x (64 MiB)."""
    cap = 64 * 1024 * 1024  # conservative fallback (v7x per-TC)
    try:
        info = pltpu.get_tpu_info()
        cap = int(getattr(info, "vmem_capacity_bytes", cap))
    except Exception:
        pass
    return (3 * cap) // 4


def _choose_tile_rows(rows, feat_lane, itemsize, vmem_limit_bytes, min_grid_steps=8):
    """Largest VMEM-fitting, sublane-aligned row tile with a grid-steps floor."""
    # Per-row VMEM estimate:
    #   double-buffered input + output tiles : 4 * feat_lane * itemsize
    #   in-kernel f32 temporaries            : ~3 * feat_lane * 4
    bytes_per_row = feat_lane * (4 * int(itemsize) + 12)
    budget = vmem_limit_bytes // 2        # headroom for scale/bias/seg matrix + compiler scratch
    max_rows = budget // bytes_per_row
    # Sublane packing: 8 for f32, 16 for bf16/f16, 32 for int8.
    pack = max(8, 32 // max(int(itemsize), 1))
    if max_rows < pack:
        # TODO(synk): add a feature-axis-tiled two-pass fallback (sum / sum-sq
        # accumulated per feat chunk in VMEM scratch) for very wide rows.
        raise ValueError(
            f"feature width {feat_lane} too wide for a single VMEM row tile "
            f"({pack * bytes_per_row} B needed, {budget} B budget)")
    tile = (int(max_rows) // pack) * pack
    # Keep >= min_grid_steps grid steps so the DMA pipeline stays full and both
    # v7x TensorCores get work under dimension_semantics=("parallel",).
    by_steps = -(-rows // min_grid_steps)
    by_steps = ((by_steps + pack - 1) // pack) * pack
    tile = min(tile, by_steps)
    if tile >= rows:
        return rows                       # single full-extent block (always layout-legal)
    return max(pack, tile)


def layer_norm(x, a_2, b_2, eps=1e-6, tile_rows=None):
    """x: (..., features). a_2, b_2: (features,). Returns same shape/dtype as x."""
    orig_shape = x.shape
    feat = orig_shape[-1]
    rows = 1
    for s in orig_shape[:-1]:
        rows *= int(s)

    # Lane-dense fold: pack k = 128//feat original rows into one 128-wide lane
    # row when feat is narrow. Pure metadata reshape (slab is row-major
    # contiguous); rows must fold evenly or we fall back to the plain layout.
    if feat < 128 and 128 % feat == 0 and rows >= (128 // feat) and rows % (128 // feat) == 0:
        k = 128 // feat
    else:
        k = 1
    feat_lane = k * feat
    rows_folded = rows // k

    x2 = x.reshape(rows_folded, feat_lane)
    if k > 1:
        a2 = jnp.tile(a_2.reshape(1, feat), (1, k))          # lane l -> a_2[l % feat]
        b2 = jnp.tile(b_2.reshape(1, feat), (1, k))
        lane_seg = jnp.arange(feat_lane, dtype=jnp.int32) // feat
        seg_mat = (lane_seg[:, None] == lane_seg[None, :]).astype(jnp.float32)
    else:
        a2 = a_2.reshape(1, feat)
        b2 = b_2.reshape(1, feat)
        seg_mat = None

    itemsize = jnp.dtype(x.dtype).itemsize
    vmem_limit = _vmem_limit_bytes()
    if tile_rows is None:
        tile_rows = _choose_tile_rows(rows_folded, feat_lane, itemsize, vmem_limit)

    # Trailing partial block (rows_folded % tile_rows != 0) is handled by Pallas
    # block padding: garbage folded rows are computed on but their writes are
    # dropped; every *valid* folded row contains only valid segments (the fold
    # requires rows % k == 0), so no garbage can leak into a valid reduction.
    grid = (pl.cdiv(rows_folded, tile_rows),)

    kernel = functools.partial(_layernorm_kernel, eps=float(eps), feat=feat, k=k)

    in_specs = [
        pl.BlockSpec((tile_rows, feat_lane), lambda i: (i, 0)),
        pl.BlockSpec((1, feat_lane), lambda i: (0, 0)),
        pl.BlockSpec((1, feat_lane), lambda i: (0, 0)),
    ]
    operands = [x2, a2, b2]
    if k > 1:
        in_specs.append(pl.BlockSpec((feat_lane, feat_lane), lambda i: (0, 0)))
        operands.append(seg_mat)

    out = pl.pallas_call(
        kernel,
        out_shape=jax.ShapeDtypeStruct((rows_folded, feat_lane), x.dtype),
        grid_spec=pltpu.PrefetchScalarGridSpec(
            num_scalar_prefetch=0,
            grid=grid,
            in_specs=in_specs,
            out_specs=pl.BlockSpec((tile_rows, feat_lane), lambda i: (i, 0)),
        ),
        compiler_params=pltpu.CompilerParams(
            # "parallel" lets v7x shard the row axis across its 2 TensorCores.
            dimension_semantics=("parallel",),
            # Derived from physical VMEM: ~96 MiB on v5e/v6e, ~48 MiB on v7x.
            vmem_limit_bytes=vmem_limit,
        ),
    )(*operands)

    return out.reshape(orig_shape)


if __name__ == "__main__":
    key = jax.random.PRNGKey(0)
    B, S, H = 2, 8, 32
    x = jax.random.normal(key, (B, S, H), dtype=jnp.float32)

    # Deterministic parameter init matching nn.Parameter(torch.ones/zeros(features))
    a_2 = jnp.ones((H,), dtype=jnp.float32)
    b_2 = jnp.zeros((H,), dtype=jnp.float32)
    eps = 1e-6

    y = layer_norm(x, a_2, b_2, eps=eps)
    y = jax.block_until_ready(y)

    # Reference in plain JAX (unbiased std, eps added to std — same formula as
    # the PyTorch module).
    mean = jnp.mean(x, axis=-1, keepdims=True)
    var_unbiased = jnp.sum((x - mean) ** 2, axis=-1, keepdims=True) / (H - 1)
    y_ref = a_2 * (x - mean) / (jnp.sqrt(var_unbiased) + eps) + b_2

    assert y.shape == x.shape and y.dtype == x.dtype
    assert jnp.allclose(y, y_ref, atol=1e-4, rtol=1e-4), float(
        jnp.max(jnp.abs(y - y_ref))
    )

    print("KERNEL_OK")
</pallas_src>

<mosaic_0001>
module attributes {stable_mosaic.version = 11 : i64} {
  func.func @_layernorm_kernel(%arg0: i32, %arg1: memref<4x128xf32, #tpu.memory_space<vmem>>, %arg2: memref<1x128xf32, #tpu.memory_space<vmem>>, %arg3: memref<1x128xf32, #tpu.memory_space<vmem>>, %arg4: memref<128x128xf32, #tpu.memory_space<vmem>>, %arg5: memref<4x128xf32, #tpu.memory_space<vmem>>) attributes {dimension_semantics = [#tpu.dimension_semantics<parallel>], iteration_bounds = array<i64: 1>, scalar_prefetch = 0 : i64, scratch_operands = 0 : i64, tpu.core_type = #tpu.core_type<tc>, window_params = [{transform_indices = @transform_0, window_bounds = array<i64: 4, 128>}, {pipeline_mode = #tpu.pipeline_mode<synchronous>, transform_indices = @transform_1, window_bounds = array<i64: 1, 128>}, {pipeline_mode = #tpu.pipeline_mode<synchronous>, transform_indices = @transform_2, window_bounds = array<i64: 1, 128>}, {pipeline_mode = #tpu.pipeline_mode<synchronous>, transform_indices = @transform_3, window_bounds = array<i64: 128, 128>}, {transform_indices = @transform_4, window_bounds = array<i64: 4, 128>}]} {
    %c0 = arith.constant 0 : index
    %c0_0 = arith.constant 0 : index
    %0 = vector.load %arg1[%c0, %c0_0] : memref<4x128xf32, #tpu.memory_space<vmem>>, vector<4x128xf32>
    %c0_1 = arith.constant 0 : index
    %c0_2 = arith.constant 0 : index
    %1 = vector.load %arg2[%c0_1, %c0_2] : memref<1x128xf32, #tpu.memory_space<vmem>>, vector<1x128xf32>
    %c0_3 = arith.constant 0 : index
    %c0_4 = arith.constant 0 : index
    %2 = vector.load %arg3[%c0_3, %c0_4] : memref<1x128xf32, #tpu.memory_space<vmem>>, vector<1x128xf32>
    %c0_5 = arith.constant 0 : index
    %c0_6 = arith.constant 0 : index
    %3 = vector.load %arg4[%c0_5, %c0_6] : memref<128x128xf32, #tpu.memory_space<vmem>>, vector<128x128xf32>
    %cst = arith.constant dense<0.000000e+00> : vector<4x128xf32>
    %4 = tpu.matmul %0, %3, %cst {dimension_numbers = #tpu.dot_dimension_numbers<[1], [0], [0], [1], [0, 0, 1, 1], [], []>} : vector<4x128xf32>, vector<128x128xf32>, vector<4x128xf32> -> vector<4x128xf32>
    %cst_7 = arith.constant 3.125000e-02 : f32
    %5 = vector.broadcast %cst_7 : f32 to vector<4x128xf32>
    %6 = arith.mulf %4, %5 : vector<4x128xf32>
    %7 = arith.subf %0, %6 : vector<4x128xf32>
    %8 = arith.mulf %7, %7 : vector<4x128xf32>
    %cst_8 = arith.constant dense<0.000000e+00> : vector<4x128xf32>
    %9 = tpu.matmul %8, %3, %cst_8 {dimension_numbers = #tpu.dot_dimension_numbers<[1], [0], [0], [1], [0, 0, 1, 1], [], []>} : vector<4x128xf32>, vector<128x128xf32>, vector<4x128xf32> -> vector<4x128xf32>
    %cst_9 = arith.constant 0.0322580636 : f32
    %10 = vector.broadcast %cst_9 : f32 to vector<4x128xf32>
    %11 = arith.mulf %9, %10 : vector<4x128xf32>
    %cst_10 = arith.constant 0.000000e+00 : f32
    %12 = vector.broadcast %cst_10 : f32 to vector<4x128xf32>
    %13 = arith.maximumf %11, %12 : vector<4x128xf32>
    %14 = math.sqrt %13 : vector<4x128xf32>
    %cst_11 = arith.constant 9.99999997E-7 : f32
    %15 = vector.broadcast %cst_11 : f32 to vector<4x128xf32>
    %16 = arith.addf %14, %15 : vector<4x128xf32>
    %17 = tpu.reciprocal %16 : vector<4x128xf32> -> vector<4x128xf32>
    %18 = arith.mulf %7, %17 : vector<4x128xf32>
    %19 = vector.broadcast %1 : vector<1x128xf32> to vector<4x128xf32>
    %20 = arith.mulf %18, %19 : vector<4x128xf32>
    %21 = vector.broadcast %2 : vector<1x128xf32> to vector<4x128xf32>
    %22 = arith.addf %20, %21 : vector<4x128xf32>
    %c0_12 = arith.constant 0 : index
    %c0_13 = arith.constant 0 : index
    %23 = vector.load %arg5[%c0_12, %c0_13] : memref<4x128xf32, #tpu.memory_space<vmem>>, vector<4x128xf32>
    tpu.vector_store %arg5[%c0_12, %c0_13], %22 {strides = array<i32>} : memref<4x128xf32, #tpu.memory_space<vmem>>, vector<4x128xf32>,
    return
  }
  func.func @transform_0(%arg0: i32) -> (i32, i32) {
    %c0_i32 = arith.constant 0 : i32
    %c0_i32_0 = arith.constant 0 : i32
    return %arg0, %c0_i32 : i32, i32
  }
  func.func @transform_1(%arg0: i32) -> (i32, i32) {
    %c0_i32 = arith.constant 0 : i32
    %c0_i32_0 = arith.constant 0 : i32
    %c0_i32_1 = arith.constant 0 : i32
    return %c0_i32, %c0_i32_0 : i32, i32
  }
  func.func @transform_2(%arg0: i32) -> (i32, i32) {
    %c0_i32 = arith.constant 0 : i32
    %c0_i32_0 = arith.constant 0 : i32
    %c0_i32_1 = arith.constant 0 : i32
    return %c0_i32, %c0_i32_0 : i32, i32
  }
  func.func @transform_3(%arg0: i32) -> (i32, i32) {
    %c0_i32 = arith.constant 0 : i32
    %c0_i32_0 = arith.constant 0 : i32
    %c0_i32_1 = arith.constant 0 : i32
    return %c0_i32, %c0_i32_0 : i32, i32
  }
  func.func @transform_4(%arg0: i32) -> (i32, i32) {
    %c0_i32 = arith.constant 0 : i32
    %c0_i32_0 = arith.constant 0 : i32
    return %arg0, %c0_i32 : i32, i32
  }
}

</mosaic_0001>

<bundles_post_ra>
// kernel: tpu_custom_call.1
= control target key start
LH: loop header
LB: loop body
LE: loop exit
PB: predicated region body
PF: predicated region fallthrough
CT: control target
= control target key end

     0   :  { %9 = vsyncpa [#allocation3], 0  ;;  %s569_s0 = inlined_call_operand.hbm [shape: f32[4,128], index: 0, kind: input, shape index: {}]   ;;  %s570_s1 = inlined_call_operand.vmem [shape: f32[1,128], index: 1, kind: input, shape index: {}]   ;;  %s571_s2 = inlined_call_operand.vmem [shape: f32[1,128], index: 2, kind: input, shape index: {}]   ;;  %s572_s3 = inlined_call_operand.hbm [shape: f32[128,128], index: 3, kind: input, shape index: {}]   ;;  %s573_s4 = inlined_call_operand.hbm [shape: f32[4,128], index: 4, kind: output, shape index: {}]  }
   0x1   :  { %10 = vsyncpa [#allocation6], 0 }
   0x2   :  { %11 = vsyncpa [#allocation4], 0  ;;  %s487_s15 = smov [#allocation2]   ;;  %s488_s17 = smov [#allocation5]  }
   0x3   :  { %s18_s16 = sshll.u32 %s487_s15, 4  ;;  %s31_s18 = sshll.u32 %s488_s17, 4  ;;  %s19_s16 = int_to_ptr.vmem [resolvable:$true] %s18_s16  ;;  %s520_s18 = int_to_ptr.vmem [resolvable:$true] %s31_s18 }
   0x4   :  { %s415_s21 = scalar_lea.hbm %s569_s0, 64 }
   0x5   :  { %p416_p0 = scmp.ne.s32.totalorder %s569_s0, %s415_s21  ;;  %p419_p1 = scmp.lt.u32.totalorder %s415_s21, %s569_s0 }
   0x7   :  { %p421_p2 = pnand %p419_p1, %p416_p0 }
   0x9   :  { %424 = shalt.err (!%p421_p2)
}
   0xa   :  { %s425_s26 = scalar_lea.vmem %s19_s16, 64  ;;  %p430_p4 = scmp.lt.s32.totalorder %s19_s16, %s19_s16 }
   0xb   :  { %p426_p3 = scmp.ne.s32.totalorder %s19_s16, %s425_s26  ;;  %p431_p5 = scmp.lt.s32.totalorder %s425_s26, %s425_s26 }
   0xd   :  { %p432_p6 = por %p431_p5, %p430_p4 }
   0xf   :  { %p433_p7 = pnand %p432_p6, %p426_p3 }
  0x11   :  { %436 = shalt.err (!%p433_p7)
}
  0x12   :  { %21 = dma.hbm_to_vmem [thread:$0]  %s569_s0, 64, %s19_s16, [#allocation3]  }
  0x13   :  { %s437_s5 = scalar_lea.hbm %s572_s3, 2048 }
  0x14   :  { %p438_p8 = scmp.ne.s32.totalorder %s572_s3, %s437_s5  ;;  %p441_p9 = scmp.lt.u32.totalorder %s437_s5, %s572_s3 }
  0x16   :  { %p443_p10 = pnand %p441_p9, %p438_p8 }
  0x18   :  { %446 = shalt.err (!%p443_p10)
}
  0x19   :  { %s447_s10 = scalar_lea.vmem %s520_s18, 2048  ;;  %p452_p12 = scmp.lt.s32.totalorder %s520_s18, %s520_s18 }
  0x1a   :  { %p448_p11 = scmp.ne.s32.totalorder %s520_s18, %s447_s10  ;;  %p453_p13 = scmp.lt.s32.totalorder %s447_s10, %s447_s10 }
  0x1c   :  { %p454_p0 = por %p453_p13, %p452_p12 }
  0x1e   :  { %p455_p1 = pnand %p454_p0, %p448_p11 }
  0x20   :  { %458 = shalt.err (!%p455_p1)
}
  0x21   :  { %s489_s0 = smov 128   ;;  %s490_s11 = smov 8  }
  0x22   :  { %37 = dma.hbm_to_vmem [thread:$0]  %s572_s3, 2048, %s520_s18, [#allocation6], %s489_s0, %s489_s0, %s490_s11  }
  0x23   :  { %481 = dma.done.wait [#allocation3], 64  }
  0x24   :  { %482 = vsyncadd [#allocation3], 4294967232 }
  0x25   :  { %483 = dma.done.wait [#allocation6], 2048  }
  0x26   :  { %484 = vsyncadd [#allocation6], 4294965248  ;;  %v491_v0 = vmov 0.0|0.0   ;;  %vm492_vm0 = vmmov 0   ;;  %v493_v1 = vmov 0.0   ;;  %v47_v2 = vld [vmem:[#allocation5] sm:$0xff] }
  0x27   :  { %355 = vmatprep.subr.bf16.mxu0 %v491_v0  ;;  %317 = vmatprep.mubr.msk.f32.mxu0 %vm492_vm0, %v493_v1  ;;  %v48_v3 = vld [vmem:[#allocation5 + $0x8] sm:$0xff]  ;;  %v49_v4 = vld [vmem:[#allocation5 + $0x10] sm:$0xff]  ;;  %v50_v6 = vld [vmem:[#allocation5 + $0x18] sm:$0xff]  ;;  %s494_s17 = smov [#allocation7]  }
  0x28   :  { %379 = vmatprep.subr.bf16.mxu1 %v491_v0  ;;  %352 = vmatprep.mubr.msk.f32.mxu1 %vm492_vm0, %v493_v1  ;;  %v356_v5 = vpack.c.bf16 %v48_v3, %v47_v2  ;;  %v359_v7 = vpack.c.bf16 %v50_v6, %v49_v4  ;;  %v51_v8 = vld [vmem:[#allocation5 + $0x20] sm:$0xff]  ;;  %v52_v9 = vld [vmem:[#allocation5 + $0x28] sm:$0xff]  ;;  %v53_v11 = vld [vmem:[#allocation5 + $0x30] sm:$0xff]  ;;  %s239_s18 = sshll.u32 %s494_s17, 4  ;;  %s240_s18 = int_to_ptr.vmem [resolvable:$true] %s239_s18 }
  0x29   :  { %v362_v10 = vpack.c.bf16 %v52_v9, %v51_v8  ;;  %v54_v12 = vld [vmem:[#allocation5 + $0x38] sm:$0xff]  ;;  %v55_v14 = vld [vmem:[#allocation5 + $0x40] sm:$0xff]  ;;  %v56_v15 = vld [vmem:[#allocation5 + $0x48] sm:$0xff]  ;;  %s459_s19 = scalar_lea.vmem %s240_s18, 64  ;;  %p464_p3 = scmp.lt.s32.totalorder %s240_s18, %s240_s18 }
  0x2a   :  { %357 = vmatpush3.bf16.msra.mxu0 %v356_v5  ;;  %381 = vmatpush3.bf16.msra.mxu1 %v356_v5  ;;  %v365_v13 = vpack.c.bf16 %v54_v12, %v53_v11  ;;  %v368_v16 = vpack.c.bf16 %v56_v15, %v55_v14  ;;  %v57_v17 = vld [vmem:[#allocation5 + $0x50] sm:$0xff]  ;;  %v58_v18 = vld [vmem:[#allocation5 + $0x58] sm:$0xff]  ;;  %v59_v20 = vld [vmem:[#allocation5 + $0x60] sm:$0xff]  ;;  %p460_p2 = scmp.ne.s32.totalorder %s240_s18, %s459_s19  ;;  %p465_p4 = scmp.lt.s32.totalorder %s459_s19, %s459_s19 }
  0x2b   :  { %358 = vmatprep.subr.bf16.mxu0 %v491_v0  ;;  %382 = vmatprep.subr.bf16.mxu1 %v491_v0  ;;  %v371_v19 = vpack.c.bf16 %v58_v18, %v57_v17  ;;  %v60_v21 = vld [vmem:[#allocation5 + $0x68] sm:$0xff]  ;;  %v61_v23 = vld [vmem:[#allocation5 + $0x70] sm:$0xff]  ;;  %v62_v24 = vld [vmem:[#allocation5 + $0x78] sm:$0xff] }
  0x2c   :  { %v374_v22 = vpack.c.bf16 %v60_v21, %v59_v20  ;;  %v377_v25 = vpack.c.bf16 %v62_v24, %v61_v23  ;;  %v44_v26 = vld [vmem:[#allocation2] sm:$0xf]  ;;  %p466_p5 = por %p465_p4, %p464_p3 }
  0x2d   :  { %v249_v43 = vld [vmem:[%s570_s1] ss:$0 sm:$0xff] }
  0x2e   :  { %360 = vmatpush3.bf16.msra.mxu0 %v359_v7  ;;  %384 = vmatpush3.bf16.msra.mxu1 %v359_v7  ;;  %v250_v45 = vld [vmem:[%s571_s2] ss:$0 sm:$0xff]  ;;  %p467_p6 = pnand %p466_p5, %p460_p2 }
  0x2f   :  { %361 = vmatprep.subr.bf16.mxu0 %v491_v0  ;;  %385 = vmatprep.subr.bf16.mxu1 %v491_v0 }
  0x32   :  { %363 = vmatpush3.bf16.msra.mxu0 %v362_v10  ;;  %387 = vmatpush3.bf16.msra.mxu1 %v362_v10 }
  0x33   :  { %364 = vmatprep.subr.bf16.mxu0 %v491_v0  ;;  %388 = vmatprep.subr.bf16.mxu1 %v491_v0 }
  0x36   :  { %366 = vmatpush3.bf16.msra.mxu0 %v365_v13  ;;  %390 = vmatpush3.bf16.msra.mxu1 %v365_v13 }
  0x37   :  { %367 = vmatprep.subr.bf16.mxu0 %v491_v0  ;;  %391 = vmatprep.subr.bf16.mxu1 %v491_v0 }
  0x3a   :  { %369 = vmatpush3.bf16.msra.mxu0 %v368_v16  ;;  %393 = vmatpush3.bf16.msra.mxu1 %v368_v16 }
  0x3b   :  { %370 = vmatprep.subr.bf16.mxu0 %v491_v0  ;;  %394 = vmatprep.subr.bf16.mxu1 %v491_v0 }
  0x3e   :  { %372 = vmatpush3.bf16.msra.mxu0 %v371_v19  ;;  %396 = vmatpush3.bf16.msra.mxu1 %v371_v19 }
  0x3f   :  { %373 = vmatprep.subr.bf16.mxu0 %v491_v0  ;;  %397 = vmatprep.subr.bf16.mxu1 %v491_v0 }
  0x42   :  { %375 = vmatpush3.bf16.msra.mxu0 %v374_v22  ;;  %399 = vmatpush3.bf16.msra.mxu1 %v374_v22 }
  0x43   :  { %376 = vmatprep.subr.bf16.mxu0 %v491_v0  ;;  %400 = vmatprep.subr.bf16.mxu1 %v491_v0 }
  0x46   :  { %378 = vmatpush3.bf16.msra.mxu0 %v377_v25  ;;  %402 = vmatpush3.bf16.msra.mxu1 %v377_v25 }
  0x49   :  { %318 = vmatmul.mubr.f32.vlgmr.msra.gmra.mrb[0].mxu0 %v44_v26 }
 0x11c   :  { %v129_v27 = vpop.f32.mrb[0].mxu0 }
 0x11d   :  { %v133_v28 = vmul.f32 0.03125, %v129_v27  ;;  %v319_v29 = vpop.f32.mrb[1].mxu0 }
 0x11f   :  { %v134_v30 = vsub.f32 %v44_v26, %v133_v28 }
 0x121   :  { %v135_v31 = vmul.f32 %v134_v30, %v134_v30 }
 0x123   :  { %353 = vmatmul.mubr.f32.vlgmr.msra.gmra.mrb[0].mxu1 %v135_v31 }
 0x1f6   :  { %v202_v32 = vpop.f32.mrb[0].mxu1 }
 0x1f7   :  { %v206_v33 = vmul.f32 0.032258064, %v202_v32  ;;  %v354_v34 = vpop.f32.mrb[1].mxu1 }
 0x1f9   :  { %v207_v35 = vmax.f32 %v206_v33, 0.0 }
 0x1fb   :  { %411 = vrsqrt.f32 %v207_v35  ;;  %vm210_vm1 = vcmp.eq.f32.partialorder %v207_v35, inf  ;;  %v213_v38 = vand.u32 2147483648, %v207_v35  ;;  %vm212_vm2 = vcmp.eq.f32.partialorder %v207_v35, 0.0 }
 0x205   :  { %v412_v36 = vpop.eup %411 }
 0x206   :  { %v209_v37 = vmul.f32 %v412_v36, %v207_v35 }
 0x208   :  { %v211_v39 = vsel %vm210_vm1, %v207_v35, %v209_v37 }
 0x209   :  { %v214_v40 = vsel %vm212_vm2, %v213_v38, %v211_v39 }
 0x20a   :  { %v215_v41 = vadd.f32 1e-06, %v214_v40 }
 0x20c   :  { %413 = vrcp.f32 %v215_v41 }
 0x216   :  { %v414_v42 = vpop.eup %413 }
 0x217   :  { %v217_v44 = vmul.f32 %v414_v42, %v134_v30 }
 0x219   :  { %v224_v46 = vmul.f32 %v249_v43, %v217_v44 }
 0x21b   :  { %v231_v47 = vadd.f32 %v250_v45, %v224_v46 }
 0x21d   :  { %232 = vst [vmem:[#allocation7] sm:$0xf] %v231_v47 }
 0x21e   :  { %470 = shalt.err (!%p467_p6)
}
 0x21f   :  { %s471_s21 = scalar_lea.hbm %s573_s4, 64 }
 0x220   :  { %p472_p7 = scmp.ne.s32.totalorder %s573_s4, %s471_s21  ;;  %p475_p8 = scmp.lt.u32.totalorder %s471_s21, %s573_s4 }
 0x222   :  { %p477_p9 = pnand %p475_p8, %p472_p7 }
 0x224   :  { %480 = shalt.err (!%p477_p9)
}
 0x225   :  { %242 = dma.vmem_to_hbm [thread:$0]  %s240_s18, 64, %s573_s4, [#allocation4]  }
 0x226   :  { %485 = dma.done.wait [#allocation4], 64  }
 0x227   :  { %486 = vsyncadd [#allocation4], 4294967232 }
 0x228   :  { %246 = vsyncpa [#allocation3], 1 }
 0x229   :  { %247 = vsyncpa [#allocation6], 1 }
 0x22a   :  { %248 = vsyncpa [#allocation4], 1 }

</bundles_post_ra>
